<compile_context>
chip_gen: v7x
topology: tpu7x:2x2x1
jax: 0.10.0
libtpu: 0.0.40
codegen_flags: <defaults>
</compile_context>

<pallas_src>
import functools
import numpy as np
import jax
import jax.numpy as jnp
from jax.experimental import pallas as pl
from jax.experimental.pallas import tpu as pltpu


def _confidence_ce_kernel(logits_ref, labels_ref, w_ref, acc_ref, *, padding_value):
    """Per (batch, row-block) tile: log-softmax CE + masked/weighted partial sums.

    acc_ref is a lane-packed (1, 1, 128) accumulator, resident across the row
    axis (lanes 0..4 = [sum_ce, n_valid, sum_w_ce, sum_w, n_sentiment]).
    """
    i = pl.program_id(1)

    @pl.when(i == 0)
    def _():
        acc_ref[...] = jnp.zeros_like(acc_ref)

    x = logits_ref[0].astype(jnp.float32)        # (tm, V)  (bf16 inputs upcast here)
    labels = labels_ref[0]                       # (tm, 1) int32
    w = w_ref[0].astype(jnp.float32)             # (tm, 1)

    valid = labels != padding_value              # (tm, 1)
    validf = valid.astype(jnp.float32)
    # Zero rows that are padding / outside the [start_p, end_p) window / beyond T
    # (partial boundary blocks may carry uninitialized data -> avoid inf*0 = NaN).
    x = jnp.where(valid, x, 0.0)

    # Single sweep over the vocab (lane) axis: stable log-sum-exp + label pick.
    m = jnp.max(x, axis=-1, keepdims=True)
    e = jnp.exp(x - m)
    lse = jnp.log(jnp.sum(e, axis=-1, keepdims=True)) + m        # (tm, 1)

    safe = jnp.where(valid, labels, 0)
    col = jax.lax.broadcasted_iota(jnp.int32, x.shape, 1)
    picked = jnp.sum(jnp.where(col == safe, x, 0.0), axis=-1, keepdims=True)

    ce_tok = lse - picked                        # -log p(label), (tm, 1)
    w = w * validf                               # ignored tokens get 0 weight

    s_ce = jnp.sum(ce_tok * validf, keepdims=True).reshape(1, 1, 1)
    s_cnt = jnp.sum(validf, keepdims=True).reshape(1, 1, 1)
    s_wce = jnp.sum(ce_tok * w, keepdims=True).reshape(1, 1, 1)
    s_w = jnp.sum(w, keepdims=True).reshape(1, 1, 1)
    s_m = jnp.sum((w > 0).astype(jnp.float32), keepdims=True).reshape(1, 1, 1)

    lane = jax.lax.broadcasted_iota(jnp.int32, acc_ref.shape, 2)  # (1, 1, 128)
    packed = (jnp.where(lane == 0, s_ce, 0.0)
              + jnp.where(lane == 1, s_cnt, 0.0)
              + jnp.where(lane == 2, s_wce, 0.0)
              + jnp.where(lane == 3, s_w, 0.0)
              + jnp.where(lane == 4, s_m, 0.0))
    acc_ref[...] += packed


def confidence_sentiment_control_loss(input_labels, generation_logits, token_weights,
                                      *, alpha, mask_mean, padding_value=-1,
                                      start_p=1, end_p=None, block_rows=None,
                                      vmem_limit_bytes=48 * 1024 * 1024):
    """input_labels: (B,T) int; generation_logits: (B,T,V) f32/bf16;
       token_weights: (B,T) f32 (dense per-token sentiment confidences)."""
    B, T, V = generation_logits.shape
    end = T if end_p is None else end_p
    t0 = start_p - 1                 # first logits time step used
    t1 = end - 1                     # one past the last logits time step used
    assert 0 <= t0 < t1 <= T - 1, "empty (start_p, end_p) window"

    itemsize = jnp.dtype(generation_logits.dtype).itemsize
    sub = 8 if itemsize >= 4 else (16 if itemsize == 2 else 32)   # sublane packing
    if block_rows is None:
        # Size the logits tile to ~8 MiB per buffer (double-buffered by Pallas),
        # capped by the actual time window; keeps well inside the scoped VMEM limit.
        budget = 8 * 1024 * 1024
        rows = max(sub, min(budget // max(V * itemsize, 1), 512))
        rows = (rows // sub) * sub
        cap = ((t1 + sub - 1) // sub) * sub
        block_rows = max(sub, min(rows, cap))
    assert block_rows % sub == 0

    tb0 = t0 // block_rows                          # block-aligned time base
    n_tblocks = pl.cdiv(t1, block_rows) - tb0
    base = tb0 * block_rows
    t_cov = n_tblocks * block_rows

    # Align labels/weights to the *logits* time index: label(t) = input_labels[t+1].
    # These are tiny (B, T) arrays; the big logits tensor is never copied on host.
    t_idx = jnp.arange(T)
    in_win = (t_idx >= t0) & (t_idx < t1)
    lab = jnp.pad(input_labels.astype(jnp.int32)[:, 1:], ((0, 0), (0, 1)),
                  constant_values=padding_value)
    wgt = jnp.pad(token_weights.astype(jnp.float32)[:, 1:], ((0, 0), (0, 1)))
    lab = jnp.where(in_win[None, :], lab, padding_value)
    wgt = jnp.where(in_win[None, :], wgt, 0.0)
    pad_r = base + t_cov - T
    if pad_r > 0:
        lab = jnp.pad(lab, ((0, 0), (0, pad_r)), constant_values=padding_value)
        wgt = jnp.pad(wgt, ((0, 0), (0, pad_r)))
    lab = lab[:, base:base + t_cov].reshape(B, t_cov, 1)
    wgt = wgt[:, base:base + t_cov].reshape(B, t_cov, 1)

    acc = pl.pallas_call(
        functools.partial(_confidence_ce_kernel, padding_value=padding_value),
        out_shape=jax.ShapeDtypeStruct((B, 1, 128), jnp.float32),
        grid_spec=pltpu.PrefetchScalarGridSpec(
            num_scalar_prefetch=0,
            grid=(B, n_tblocks),
            in_specs=[
                pl.BlockSpec((1, block_rows, V), lambda b, i: (b, tb0 + i, 0)),
                pl.BlockSpec((1, block_rows, 1), lambda b, i: (b, i, 0)),
                pl.BlockSpec((1, block_rows, 1), lambda b, i: (b, i, 0)),
            ],
            out_specs=pl.BlockSpec((1, 1, 128), lambda b, i: (b, 0, 0)),
        ),
        compiler_params=pltpu.CompilerParams(
            dimension_semantics=("parallel", "arbitrary"),   # batch axis megacore-shardable
            vmem_limit_bytes=vmem_limit_bytes),
    )(generation_logits, lab, wgt)

    totals = jnp.sum(acc, axis=(0, 1))              # (128,) — sum per-batch partials
    sum_ce, cnt, sum_wce, sum_w, sum_mask = (totals[k] for k in range(5))

    ce_loss = sum_ce / jnp.maximum(cnt, 1.0)
    denom = sum_mask if mask_mean else sum_w
    sent_loss = jnp.where(denom > 0, sum_wce / jnp.maximum(denom, 1e-9), 0.0)
    return ce_loss + alpha * sent_loss


def build_token_weights(sentiment_atoms, confidences, B, T):
    """Glue (ragged Python lists -> dense per-token weights); no Pallas equivalent."""
    w = np.zeros((B, T), dtype=np.float32)
    for b, (atoms, confs) in enumerate(zip(sentiment_atoms, confidences)):
        for atom, c in zip(atoms, confs):
            for pos in atom:
                if 0 <= pos < T:
                    w[b, pos] = float(c)
    return jnp.asarray(w)


def _reference_loss(input_labels, generation_logits, token_weights, *, alpha, mask_mean,
                    padding_value=-1, start_p=1, end_p=None):
    """Pure-JAX reference (same semantics) for a correctness spot check."""
    B, T, V = generation_logits.shape
    end = T if end_p is None else end_p
    x = generation_logits[:, start_p - 1:end - 1, :].reshape(-1, V).astype(jnp.float32)
    y = input_labels[:, start_p:end].reshape(-1)
    w = token_weights[:, start_p:end].reshape(-1).astype(jnp.float32)
    valid = y != padding_value
    logp = jax.nn.log_softmax(x, axis=-1)
    nll = -jnp.take_along_axis(logp, jnp.where(valid, y, 0)[:, None], axis=-1)[:, 0]
    vf = valid.astype(jnp.float32)
    ce = jnp.sum(nll * vf) / jnp.maximum(jnp.sum(vf), 1.0)
    w = w * vf
    denom = jnp.sum((w > 0).astype(jnp.float32)) if mask_mean else jnp.sum(w)
    sent = jnp.where(denom > 0, jnp.sum(nll * w) / jnp.maximum(denom, 1e-9), 0.0)
    return ce + alpha * sent


if __name__ == "__main__":
    B, T, V = 2, 8, 256
    alpha, mask_mean, padding_value = 0.5, True, -1

    key = jax.random.PRNGKey(0)
    k1, k2 = jax.random.split(key)

    generation_logits = jax.random.normal(k1, (B, T, V), dtype=jnp.float32)
    input_labels = jax.random.randint(k2, (B, T), 0, V, dtype=jnp.int32)
    # mark a couple of trailing positions as padding
    input_labels = input_labels.at[0, -1].set(padding_value)
    input_labels = input_labels.at[1, -2:].set(padding_value)

    # sentiment_atoms: per batch -> list of atoms -> list of token positions
    sentiment_atoms = [[[2, 3], [5]], [[1], [4, 5]]]
    confidences = [[0.9, 0.4], [0.7, 0.6]]
    token_weights = build_token_weights(sentiment_atoms, confidences, B, T)

    loss = confidence_sentiment_control_loss(
        input_labels, generation_logits, token_weights,
        alpha=alpha, mask_mean=mask_mean, padding_value=padding_value,
        start_p=1, end_p=None)
    loss = jax.block_until_ready(loss)

    ref = _reference_loss(
        input_labels, generation_logits, token_weights,
        alpha=alpha, mask_mean=mask_mean, padding_value=padding_value,
        start_p=1, end_p=None)
    ref = jax.block_until_ready(ref)

    assert jnp.isfinite(loss), loss
    assert jnp.allclose(loss, ref, rtol=1e-4, atol=1e-4), (loss, ref)
    print("KERNEL_OK")
</pallas_src>

<mosaic_0001>
module attributes {stable_mosaic.version = 11 : i64} {
  func.func @_confidence_ce_kernel(%arg0: i32, %arg1: i32, %arg2: memref<1x8x256xf32, #tpu.memory_space<vmem>>, %arg3: memref<1x8x1xi32, #tpu.memory_space<vmem>>, %arg4: memref<1x8x1xf32, #tpu.memory_space<vmem>>, %arg5: memref<1x1x128xf32, #tpu.memory_space<vmem>>) attributes {dimension_semantics = [#tpu.dimension_semantics<parallel>, #tpu.dimension_semantics<arbitrary>], iteration_bounds = array<i64: 2, 1>, scalar_prefetch = 0 : i64, scratch_operands = 0 : i64, tpu.core_type = #tpu.core_type<tc>, window_params = [{transform_indices = @transform_0, window_bounds = array<i64: 1, 8, 256>}, {transform_indices = @transform_1, window_bounds = array<i64: 1, 8, 1>}, {transform_indices = @transform_2, window_bounds = array<i64: 1, 8, 1>}, {transform_indices = @transform_3, window_bounds = array<i64: 1, 1, 128>}]} {
    %c0_i32 = arith.constant 0 : i32
    %0 = arith.cmpi eq, %arg1, %c0_i32 : i32
    %1 = arith.extui %0 : i1 to i32
    %c0_i32_0 = arith.constant 0 : i32
    %2 = arith.cmpi ne, %1, %c0_i32_0 : i32
    scf.if %2 {
      %cst_32 = arith.constant 0.000000e+00 : f32
      %111 = vector.broadcast %cst_32 : f32 to vector<1x1x128xf32>
      %c0_33 = arith.constant 0 : index
      %c0_34 = arith.constant 0 : index
      %c0_35 = arith.constant 0 : index
      %112 = vector.load %arg5[%c0_33, %c0_34, %c0_35] : memref<1x1x128xf32, #tpu.memory_space<vmem>>, vector<1x1x128xf32>
      tpu.vector_store %arg5[%c0_33, %c0_34, %c0_35], %111 {strides = array<i32>} : memref<1x1x128xf32, #tpu.memory_space<vmem>>, vector<1x1x128xf32>,
    } else {
    }
    %c0 = arith.constant 0 : index
    %c0_1 = arith.constant 0 : index
    %c0_2 = arith.constant 0 : index
    %3 = vector.load %arg2[%c0, %c0_1, %c0_2] : memref<1x8x256xf32, #tpu.memory_space<vmem>>, vector<1x8x256xf32>
    %4 = vector.shape_cast %3 : vector<1x8x256xf32> to vector<8x256xf32>
    %c0_3 = arith.constant 0 : index
    %c0_4 = arith.constant 0 : index
    %c0_5 = arith.constant 0 : index
    %5 = vector.load %arg3[%c0_3, %c0_4, %c0_5] : memref<1x8x1xi32, #tpu.memory_space<vmem>>, vector<1x8x1xi32>
    %6 = vector.shape_cast %5 : vector<1x8x1xi32> to vector<8x1xi32>
    %c0_6 = arith.constant 0 : index
    %c0_7 = arith.constant 0 : index
    %c0_8 = arith.constant 0 : index
    %7 = vector.load %arg4[%c0_6, %c0_7, %c0_8] : memref<1x8x1xf32, #tpu.memory_space<vmem>>, vector<1x8x1xf32>
    %8 = vector.shape_cast %7 : vector<1x8x1xf32> to vector<8x1xf32>
    %c-1_i32 = arith.constant -1 : i32
    %9 = vector.broadcast %c-1_i32 : i32 to vector<8x1xi32>
    %10 = arith.cmpi ne, %6, %9 : vector<8x1xi32>
    %11 = arith.extui %10 : vector<8x1xi1> to vector<8x1xi32>
    %12 = arith.sitofp %11 : vector<8x1xi32> to vector<8x1xf32>
    %cst = arith.constant 0.000000e+00 : f32
    %13 = vector.shape_cast %10 : vector<8x1xi1> to vector<8x1xi1>
    %14 = vector.broadcast %13 : vector<8x1xi1> to vector<8x256xi1>
    %15 = vector.broadcast %cst : f32 to vector<8x256xf32>
    %16 = arith.select %14, %4, %15 : vector<8x256xi1>, vector<8x256xf32>
    %cst_9 = arith.constant dense<0xFF800000> : vector<8xf32>
    %17 = vector.multi_reduction <maximumf>, %16, %cst_9 [1] : vector<8x256xf32> to vector<8xf32>
    %18 = vector.shape_cast %17 : vector<8xf32> to vector<8x1xf32>
    %19 = vector.broadcast %18 : vector<8x1xf32> to vector<8x256xf32>
    %20 = arith.subf %16, %19 : vector<8x256xf32>
    %21 = math.exp %20 : vector<8x256xf32>
    %cst_10 = arith.constant dense<0.000000e+00> : vector<8xf32>
    %22 = vector.multi_reduction <add>, %21, %cst_10 [1] : vector<8x256xf32> to vector<8xf32>
    %23 = vector.shape_cast %22 : vector<8xf32> to vector<8x1xf32>
    %24 = math.log %23 : vector<8x1xf32>
    %25 = arith.addf %24, %18 : vector<8x1xf32>
    %c0_i32_11 = arith.constant 0 : i32
    %26 = vector.broadcast %c0_i32_11 : i32 to vector<8x1xi32>
    %27 = arith.select %10, %6, %26 : vector<8x1xi1>, vector<8x1xi32>
    %28 = tpu.iota {dimensions = array<i32: 1>} : vector<8x256xi32>
    %29 = vector.broadcast %27 : vector<8x1xi32> to vector<8x256xi32>
    %30 = arith.cmpi eq, %28, %29 : vector<8x256xi32>
    %cst_12 = arith.constant 0.000000e+00 : f32
    %31 = vector.broadcast %cst_12 : f32 to vector<8x256xf32>
    %32 = arith.select %30, %16, %31 : vector<8x256xi1>, vector<8x256xf32>
    %cst_13 = arith.constant dense<0.000000e+00> : vector<8xf32>
    %33 = vector.multi_reduction <add>, %32, %cst_13 [1] : vector<8x256xf32> to vector<8xf32>
    %34 = vector.shape_cast %33 : vector<8xf32> to vector<8x1xf32>
    %35 = arith.subf %25, %34 : vector<8x1xf32>
    %36 = arith.mulf %8, %12 : vector<8x1xf32>
    %37 = arith.mulf %35, %12 : vector<8x1xf32>
    %38 = vector.shape_cast %37 : vector<8x1xf32> to vector<1x8x1xf32>
    %cst_14 = arith.constant dense<0.000000e+00> : vector<1xf32>
    %39 = vector.multi_reduction <add>, %38, %cst_14 [1, 2] : vector<1x8x1xf32> to vector<1xf32>
    %40 = vector.shape_cast %39 : vector<1xf32> to vector<1x1x1xf32>
    %41 = vector.extract %40[0, 0, 0] : f32 from vector<1x1x1xf32>
    %42 = vector.broadcast %41 : f32 to vector<1x1xf32>
    %43 = vector.shape_cast %42 : vector<1x1xf32> to vector<1x1x1xf32>
    %44 = vector.shape_cast %12 : vector<8x1xf32> to vector<1x8x1xf32>
    %cst_15 = arith.constant dense<0.000000e+00> : vector<1xf32>
    %45 = vector.multi_reduction <add>, %44, %cst_15 [1, 2] : vector<1x8x1xf32> to vector<1xf32>
    %46 = vector.shape_cast %45 : vector<1xf32> to vector<1x1x1xf32>
    %47 = vector.extract %46[0, 0, 0] : f32 from vector<1x1x1xf32>
    %48 = vector.broadcast %47 : f32 to vector<1x1xf32>
    %49 = vector.shape_cast %48 : vector<1x1xf32> to vector<1x1x1xf32>
    %50 = arith.mulf %35, %36 : vector<8x1xf32>
    %51 = vector.shape_cast %50 : vector<8x1xf32> to vector<1x8x1xf32>
    %cst_16 = arith.constant dense<0.000000e+00> : vector<1xf32>
    %52 = vector.multi_reduction <add>, %51, %cst_16 [1, 2] : vector<1x8x1xf32> to vector<1xf32>
    %53 = vector.shape_cast %52 : vector<1xf32> to vector<1x1x1xf32>
    %54 = vector.extract %53[0, 0, 0] : f32 from vector<1x1x1xf32>
    %55 = vector.broadcast %54 : f32 to vector<1x1xf32>
    %56 = vector.shape_cast %55 : vector<1x1xf32> to vector<1x1x1xf32>
    %57 = vector.shape_cast %36 : vector<8x1xf32> to vector<1x8x1xf32>
    %cst_17 = arith.constant dense<0.000000e+00> : vector<1xf32>
    %58 = vector.multi_reduction <add>, %57, %cst_17 [1, 2] : vector<1x8x1xf32> to vector<1xf32>
    %59 = vector.shape_cast %58 : vector<1xf32> to vector<1x1x1xf32>
    %60 = vector.extract %59[0, 0, 0] : f32 from vector<1x1x1xf32>
    %61 = vector.broadcast %60 : f32 to vector<1x1xf32>
    %62 = vector.shape_cast %61 : vector<1x1xf32> to vector<1x1x1xf32>
    %cst_18 = arith.constant 0.000000e+00 : f32
    %63 = vector.broadcast %cst_18 : f32 to vector<8x1xf32>
    %64 = arith.cmpf ogt, %36, %63 : vector<8x1xf32>
    %65 = arith.extui %64 : vector<8x1xi1> to vector<8x1xi32>
    %66 = arith.sitofp %65 : vector<8x1xi32> to vector<8x1xf32>
    %67 = vector.shape_cast %66 : vector<8x1xf32> to vector<1x8x1xf32>
    %cst_19 = arith.constant dense<0.000000e+00> : vector<1xf32>
    %68 = vector.multi_reduction <add>, %67, %cst_19 [1, 2] : vector<1x8x1xf32> to vector<1xf32>
    %69 = vector.shape_cast %68 : vector<1xf32> to vector<1x1x1xf32>
    %70 = vector.extract %69[0, 0, 0] : f32 from vector<1x1x1xf32>
    %71 = vector.broadcast %70 : f32 to vector<1x1xf32>
    %72 = vector.shape_cast %71 : vector<1x1xf32> to vector<1x1x1xf32>
    %73 = tpu.iota {dimensions = array<i32: 2>} : vector<1x1x128xi32>
    %c0_i32_20 = arith.constant 0 : i32
    %74 = vector.broadcast %c0_i32_20 : i32 to vector<1x1x128xi32>
    %75 = arith.cmpi eq, %73, %74 : vector<1x1x128xi32>
    %cst_21 = arith.constant 0.000000e+00 : f32
    %76 = vector.shape_cast %43 : vector<1x1x1xf32> to vector<1x1x1xf32>
    %77 = vector.broadcast %76 : vector<1x1x1xf32> to vector<1x1x128xf32>
    %78 = vector.broadcast %cst_21 : f32 to vector<1x1x128xf32>
    %79 = arith.select %75, %77, %78 : vector<1x1x128xi1>, vector<1x1x128xf32>
    %c1_i32 = arith.constant 1 : i32
    %80 = vector.broadcast %c1_i32 : i32 to vector<1x1x128xi32>
    %81 = arith.cmpi eq, %73, %80 : vector<1x1x128xi32>
    %cst_22 = arith.constant 0.000000e+00 : f32
    %82 = vector.shape_cast %49 : vector<1x1x1xf32> to vector<1x1x1xf32>
    %83 = vector.broadcast %82 : vector<1x1x1xf32> to vector<1x1x128xf32>
    %84 = vector.broadcast %cst_22 : f32 to vector<1x1x128xf32>
    %85 = arith.select %81, %83, %84 : vector<1x1x128xi1>, vector<1x1x128xf32>
    %86 = arith.addf %79, %85 : vector<1x1x128xf32>
    %c2_i32 = arith.constant 2 : i32
    %87 = vector.broadcast %c2_i32 : i32 to vector<1x1x128xi32>
    %88 = arith.cmpi eq, %73, %87 : vector<1x1x128xi32>
    %cst_23 = arith.constant 0.000000e+00 : f32
    %89 = vector.shape_cast %56 : vector<1x1x1xf32> to vector<1x1x1xf32>
    %90 = vector.broadcast %89 : vector<1x1x1xf32> to vector<1x1x128xf32>
    %91 = vector.broadcast %cst_23 : f32 to vector<1x1x128xf32>
    %92 = arith.select %88, %90, %91 : vector<1x1x128xi1>, vector<1x1x128xf32>
    %93 = arith.addf %86, %92 : vector<1x1x128xf32>
    %c3_i32 = arith.constant 3 : i32
    %94 = vector.broadcast %c3_i32 : i32 to vector<1x1x128xi32>
    %95 = arith.cmpi eq, %73, %94 : vector<1x1x128xi32>
    %cst_24 = arith.constant 0.000000e+00 : f32
    %96 = vector.shape_cast %62 : vector<1x1x1xf32> to vector<1x1x1xf32>
    %97 = vector.broadcast %96 : vector<1x1x1xf32> to vector<1x1x128xf32>
    %98 = vector.broadcast %cst_24 : f32 to vector<1x1x128xf32>
    %99 = arith.select %95, %97, %98 : vector<1x1x128xi1>, vector<1x1x128xf32>
    %100 = arith.addf %93, %99 : vector<1x1x128xf32>
    %c4_i32 = arith.constant 4 : i32
    %101 = vector.broadcast %c4_i32 : i32 to vector<1x1x128xi32>
    %102 = arith.cmpi eq, %73, %101 : vector<1x1x128xi32>
    %cst_25 = arith.constant 0.000000e+00 : f32
    %103 = vector.shape_cast %72 : vector<1x1x1xf32> to vector<1x1x1xf32>
    %104 = vector.broadcast %103 : vector<1x1x1xf32> to vector<1x1x128xf32>
    %105 = vector.broadcast %cst_25 : f32 to vector<1x1x128xf32>
    %106 = arith.select %102, %104, %105 : vector<1x1x128xi1>, vector<1x1x128xf32>
    %107 = arith.addf %100, %106 : vector<1x1x128xf32>
    %c0_26 = arith.constant 0 : index
    %c0_27 = arith.constant 0 : index
    %c0_28 = arith.constant 0 : index
    %108 = vector.load %arg5[%c0_26, %c0_27, %c0_28] : memref<1x1x128xf32, #tpu.memory_space<vmem>>, vector<1x1x128xf32>
    %109 = arith.addf %108, %107 : vector<1x1x128xf32>
    %c0_29 = arith.constant 0 : index
    %c0_30 = arith.constant 0 : index
    %c0_31 = arith.constant 0 : index
    %110 = vector.load %arg5[%c0_29, %c0_30, %c0_31] : memref<1x1x128xf32, #tpu.memory_space<vmem>>, vector<1x1x128xf32>
    tpu.vector_store %arg5[%c0_29, %c0_30, %c0_31], %109 {strides = array<i32>} : memref<1x1x128xf32, #tpu.memory_space<vmem>>, vector<1x1x128xf32>,
    return
  }
  func.func @transform_0(%arg0: i32, %arg1: i32) -> (i32, i32, i32) {
    %c0_i32 = arith.constant 0 : i32
    %0 = arith.addi %c0_i32, %arg1 : i32
    %c0_i32_0 = arith.constant 0 : i32
    %c0_i32_1 = arith.constant 0 : i32
    return %arg0, %0, %c0_i32_0 : i32, i32, i32
  }
  func.func @transform_1(%arg0: i32, %arg1: i32) -> (i32, i32, i32) {
    %c0_i32 = arith.constant 0 : i32
    %c0_i32_0 = arith.constant 0 : i32
    return %arg0, %arg1, %c0_i32 : i32, i32, i32
  }
  func.func @transform_2(%arg0: i32, %arg1: i32) -> (i32, i32, i32) {
    %c0_i32 = arith.constant 0 : i32
    %c0_i32_0 = arith.constant 0 : i32
    return %arg0, %arg1, %c0_i32 : i32, i32, i32
  }
  func.func @transform_3(%arg0: i32, %arg1: i32) -> (i32, i32, i32) {
    %c0_i32 = arith.constant 0 : i32
    %c0_i32_0 = arith.constant 0 : i32
    %c0_i32_1 = arith.constant 0 : i32
    return %arg0, %c0_i32, %c0_i32_0 : i32, i32, i32
  }
}

</mosaic_0001>

<bundles_post_ra>
// kernel: tpu_custom_call.1
= control target key start
LH: loop header
LB: loop body
LE: loop exit
PB: predicated region body
PF: predicated region fallthrough
CT: control target
= control target key end

     0   :  { %8 = vsyncpa [#allocation3], 0  ;;  %s838_s0 = inlined_call_operand.vmem [shape: f32[2,8,256], index: 0, kind: input, shape index: {}]   ;;  %s839_s1 = inlined_call_operand.vmem [shape: s32[2,8,1], index: 1, kind: input, shape index: {}]   ;;  %s840_s2 = inlined_call_operand.vmem [shape: f32[2,8,1], index: 2, kind: input, shape index: {}]   ;;  %s841_s3 = inlined_call_operand.hbm [shape: f32[2,1,128], index: 3, kind: output, shape index: {}]  }
   0x1   :  { %10 = vsyncpa [#allocation3 + $0x1], 0  ;;  %s685_s12 = smov 0   ;;  %s687_s13 = smov 0  }
   0x2   :  { %s689_s14 = smov 0   ;;  %s691_s15 = smov 0  }
   0x3   :  { %s693_s16 = smov 0   ;;  %s695_s17 = smov 0  }
   0x4 LB: > { %s492_s18 = sadd.s32 4294967295, %s660_s17   ;;  %s493_s19 = sadd.s32 4294967294, %s660_s17   ;;  %s660_s17 = sphi %s695_s17, %s16_s17   ;;  %s656_s16 = sphi %s693_s16, %s848_s16   ;;  %s652_s15 = sphi %s691_s15, %s847_s15   ;;  %s648_s14 = sphi %s689_s14, %s846_s14   ;;  %s644_s13 = sphi %s687_s13, %s845_s13   ;;  %s640_s12 = sphi %s685_s12, %s844_s12  }
   0x5   : > { %s28_s20 = sadd.s32 1, %s656_s16  ;;  %s119_s21 = sadd.s32 1, %s648_s14 }
   0x6   : > { %p30_p0 = scmp.ge.s32.totalorder %s28_s20, 2  ;;  %p129_p1 = scmp.ne.s32.totalorder %s648_s14, %s644_s13 }
   0x7   : > { %p130_p2 = scmp.eq.s32.totalorder %s492_s18, 1  ;;  %p135_p3 = scmp.ne.s32.totalorder %s644_s13, %s640_s12 }
   0x8   : > { %s850_s20 = smov (%p30_p0, %s28_s20), 0  ;;  %p136_p5 = scmp.eq.s32.totalorder %s493_s19, 1 }
   0x9   : > { %p725_p4 = por %p130_p2, %p129_p1  ;;  %s116_s23 = ssub.s32 %s656_s16, %s850_s20 }
   0xa   : > { %p496_p6 = scmp.ge.s32.totalorder %s660_s17, 1  ;;  %p117_p7 = scmp.eq.s32.totalorder %s116_s23, 0 }
   0xb   : > { %p732_p8 = por %p136_p5, %p135_p3  ;;  %p186_p9 = scmp.lt.s32.totalorder %s660_s17, 3 }
   0xc   : > { %s738_s25 = scalar_select %p117_p7, %s648_s14, %s119_s21  }
   0xd   : > { %p187_p10 = pnand %p496_p6, %p186_p9 }
   0xe   : > { %p227_p11 = scmp.lt.s32.totalorder (!%p187_p10), %s652_s15, 1  ;;  %v662_v0 = vmov (!%p187_p10), 0   ;;  %v284_v4 = vlaneseq (!%p187_p10)  ;;  %vm300_vm4 = vcmask (!%p187_p10), 7168   ;;  %v663_v26 = vmov (!%p187_p10), 0.0   ;;  %s225_s11 = sand.u32 (!%p187_p10), 1, %s644_s13  }
   0xf   : > { %190 = sbr.rel (%p187_p10) target bundleno = 715 (0x2cb), region = 32  ;;  %574 = vset.pattern.permute.xlu0 (!%p187_p10), %v662_v0  ;;  %575 = vset.pattern.permute.xlu1 (!%p187_p10), %v662_v0  ;;  %s774_s18 = scalar_lea.vmem (!%p187_p10), [#allocation2], %s225_s11 }
  0x10   : > { %v753_v5 = vand.u32 (!%p187_p10), 127, %v284_v4  ;;  %254 = vst [vmem:[%s774_s18] sm:$0x1] (!%p187_p10), %v663_v26  ;;  %s503_s28 = sshll.u32 (!%p187_p10), %s652_s15, 4  ;;  %s390_s29 = sshll.u32 (!%p187_p10), %s774_s18, 4  ;;  %s790_s29 = int_to_ptr.vmem [resolvable:$true] %s390_s29 }
  0x11   : > { %s788_s5 = scalar_lea.hbm (!%p187_p10), %s841_s3, %s503_s28  ;;  %s378_s6 = scalar_lea.sflag (!%p187_p10), [#allocation3], %s225_s11 }
  0x12   : > { %v286_v6 = vadd.s32 (!%p187_p10), 128, %v753_v5  ;;  %vm355_vm6 = vcmp.eq.s32.totalorder (!%p187_p10), %v753_v5, 0  ;;  %vm358_vm7 = vcmp.eq.s32.totalorder (!%p187_p10), %v753_v5, 1  ;;  %vm362_vm8 = vcmp.eq.s32.totalorder (!%p187_p10), %v753_v5, 2 }
  0x13   : > { %vm366_vm9 = vcmp.eq.s32.totalorder (!%p187_p10), %v753_v5, 3  ;;  %vm370_vm10 = vcmp.eq.s32.totalorder (!%p187_p10), %v753_v5, 4 }
  0x16   : > { %s742_s26 = scalar_select %p227_p11, %s652_s15, 1 }
  0x17   : > { %s664_s15 = smov [#allocation2]  }
  0x18   : > { %s499_s27 = sshll.u32 %s742_s26, 3  ;;  %s506_s4 = sshll.u32 %s742_s26, 4 }
  0x19   : > { %s242_s30 = scalar_lea.vmem %s839_s1, %s499_s27  ;;  %s235_s7 = scalar_lea.vmem %s838_s0, %s506_s4 }
  0x1a   : > { %v257_v1 = vld [vmem:[%s242_s30] sm:$0xff]  ;;  %v256_v8 = vld [vmem:[%s235_s7 + $0x8] sm:$0xff]  ;;  %s249_s10 = scalar_lea.vmem %s840_s2, %s499_s27  ;;  %s586_s8 = sshll.u32 %s664_s15, 4  ;;  %s587_s8 = int_to_ptr.vmem [resolvable:$false] %s586_s8 }
  0x1b   : > { %vm259_vm0 = vcmp.ne.s32.totalorder %v257_v1, 4294967295  ;;  %v255_v7 = vld [vmem:[%s235_s7] sm:$0xff]  ;;  %s582_s7 = scalar_lea.vmem %s790_s29, 16  ;;  %s588_s9 = scalar_lea.vmem %s587_s8, 32 }
  0x1c   : > { %v260_v2 = vsel %vm259_vm0, 1, %v662_v0  ;;  %v283_v3 = vsel %vm259_vm0, %v257_v1, 0  ;;  %v258_v25 = vld [vmem:[%s249_s10] sm:$0xff]  ;;  %v501_v27 = vsel %vm259_vm0, 1.0, %v663_v26  ;;  %p583_p12 = scmp.ne.s32.totalorder %s790_s29, %s582_s7  ;;  %p589_p1 = scmp.lt.s32.totalorder %s790_s29, %s587_s8 }
  0x1d   : > { %263 = vperm.xlu0 %574, %v260_v2   ;;  %288 = vperm.xlu1 %575, %v283_v3   ;;  %v311_v28 = vsel %vm300_vm4, %v501_v27, 0.0  ;;  %v298_v29 = vmul.f32 %v501_v27, %v258_v25  ;;  %p590_p2 = scmp.lt.s32.totalorder %s588_s9, %s582_s7 }
  0x1e   : > { %p584_p13 = pnand %p583_p12, %p725_p4 }
  0x1f   : > { %v332_v30 = vsel %vm300_vm4, %v298_v29, 0.0  ;;  %vm342_vm5 = vcmp.gt.f32.partialorder %v298_v29, 0.0  ;;  %p591_p3 = por %p590_p2, %p589_p1 }
  0x20   : > { %v502_v40 = vsel %vm342_vm5, 1.0, %v663_v26  ;;  %p585_p0 = pneg %p584_p13 }
  0x21   : > { %v345_v42 = vsel %vm300_vm4, %v502_v40, 0.0 }
  0x22   : > { %p592_p5 = pnand %p591_p3, %p585_p0 }
  0x9c   : > { %v264_v9 = vpop.permute.xlu0 %263  ;;  %v289_v10 = vpop.permute.xlu1 %288 }
  0x9d   : > { %vm265_vm1 = vcmp.eq.s32.totalorder %v264_v9, 1  ;;  %vm290_vm2 = vcmp.eq.s32.totalorder %v753_v5, %v289_v10  ;;  %vm291_vm3 = vcmp.eq.s32.totalorder %v286_v6, %v289_v10 }
  0x9e   : > { %v266_v11 = vsel %vm265_vm1, %v255_v7, 0.0  ;;  %v267_v12 = vsel %vm265_vm1, %v256_v8, 0.0 }
  0x9f   : > { %v268_v13 = vmax.f32 %v266_v11, %v267_v12  ;;  %v292_v14 = vsel %vm290_vm2, %v266_v11, 0.0  ;;  %v293_v15 = vsel %vm291_vm3, %v267_v12, 0.0 }
  0xa0   : > { %v294_v16 = vadd.f32 %v293_v15, %v292_v14 }
  0xa1   : > { %269 = vmax.xlane.f32.xlu0 %v268_v13 }
  0xa5   : > { %295 = vadd.xlane.f32.xlu0 %v294_v16 }
 0x12e   : > { %v270_v17 = vpop.xlane.xlu0 %269 }
 0x12f   : > { %v271_v18 = vsub.f32 %v266_v11, %v270_v17  ;;  %v272_v19 = vsub.f32 %v267_v12, %v270_v17 }
 0x131   : > { %v273_v20 = vmul.f32 1.442695, %v271_v18  ;;  %v275_v21 = vmul.f32 1.442695, %v272_v19 }
 0x132   : > { %v296_v35 = vpop.xlane.xlu0 %295 }
 0x133   : > { %576 = vpow2.f32 %v273_v20 }
 0x134   : > { %578 = vpow2.f32 %v275_v21 }
 0x13d   : > { %v577_v22 = vpop.eup %576 }
 0x13e   : > { %v579_v23 = vpop.eup %578 }
 0x13f   : > { %v277_v24 = vadd.f32 %v579_v23, %v577_v22 }
 0x141   : > { %278 = vadd.xlane.f32.xlu1 %v277_v24 }
 0x145   : > { %312 = vadd.xlane.f32.xlu1 %v311_v28  ;;  %v374_v28 = vld [vmem:[%s774_s18] sm:$0x1] }
 0x149   : > { %333 = vadd.xlane.f32.xlu1 %v332_v30 }
 0x1ce   : > { %v279_v31 = vpop.xlane.xlu1 %278 }
 0x1cf   : > { %580 = vlog2.f32 %v279_v31 }
 0x1d2   : > { %v313_v43 = vpop.xlane.xlu1 %312 }
 0x1d3   : > { %v314_v44 = vrot.slane %v313_v43, 4 }
 0x1d5   : > { %v315_v46 = vadd.f32 %v314_v44, %v313_v43 }
 0x1d6   : > { %v334_v45 = vpop.xlane.xlu1 %333 }
 0x1d7   : > { %v335_v47 = vrot.slane %v334_v45, 4  ;;  %v316_v48 = vrot.slane %v315_v46, 2 }
 0x1d9   : > { %v581_v32 = vpop.eup %580  ;;  %v336_v49 = vadd.f32 %v335_v47, %v334_v45  ;;  %v317_v55 = vadd.f32 %v316_v48, %v315_v46 }
 0x1da   : > { %v281_v33 = vmul.f32 0.6931472, %v581_v32 }
 0x1db   : > { %v337_v53 = vrot.slane %v336_v49, 2  ;;  %v318_v62 = vrot.slane %v317_v55, 1 }
 0x1dc   : > { %v282_v34 = vadd.f32 %v281_v33, %v270_v17 }
 0x1dd   : > { %v338_v60 = vadd.f32 %v337_v53, %v336_v49  ;;  %v319_v6 = vadd.f32 %v318_v62, %v317_v55 }
 0x1de   : > { %v297_v36 = vsub.f32 %v282_v34, %v296_v35 }
 0x1df   : > { %v339_v7 = vrot.slane %v338_v60, 1 }
 0x1e0   : > { %v299_v37 = vmul.f32 %v501_v27, %v297_v36  ;;  %v321_v39 = vmul.f32 %v298_v29, %v297_v36 }
 0x1e1   : > { %v340_v12 = vadd.f32 %v339_v7, %v338_v60 }
 0x1e2   : > { %v301_v38 = vsel %vm300_vm4, %v299_v37, 0.0  ;;  %v322_v41 = vsel %vm300_vm4, %v321_v39, 0.0 }
 0x1e3   : > { %302 = vadd.xlane.f32.xlu0 %v301_v38 }
 0x1e7   : > { %323 = vadd.xlane.f32.xlu0 %v322_v41 }
 0x1eb   : > { %346 = vadd.xlane.f32.xlu0 %v345_v42 }
 0x270   : > { %v303_v50 = vpop.xlane.xlu0 %302 }
 0x271   : > { %v304_v51 = vrot.slane %v303_v50, 4 }
 0x273   : > { %v305_v52 = vadd.f32 %v304_v51, %v303_v50 }
 0x274   : > { %v324_v54 = vpop.xlane.xlu0 %323 }
 0x275   : > { %v306_v56 = vrot.slane %v305_v52, 2  ;;  %v325_v57 = vrot.slane %v324_v54, 4 }
 0x277   : > { %v326_v58 = vadd.f32 %v325_v57, %v324_v54  ;;  %v307_v59 = vadd.f32 %v306_v56, %v305_v52 }
 0x278   : > { %v347_v61 = vpop.xlane.xlu0 %346 }
 0x279   : > { %v327_v63 = vrot.slane %v326_v58, 2  ;;  %v348_v0 = vrot.slane %v347_v61, 4  ;;  %v308_v1 = vrot.slane %v307_v59, 1 }
 0x27b   : > { %v349_v2 = vadd.f32 %v348_v0, %v347_v61  ;;  %v309_v3 = vadd.f32 %v308_v1, %v307_v59  ;;  %v328_v4 = vadd.f32 %v327_v63, %v326_v58 }
 0x27d   : > { %v350_v8 = vrot.slane %v349_v2, 2  ;;  %507 = vpush %v309_v3  ;;  %v329_v9 = vrot.slane %v328_v4, 1 }
 0x27e   : > { %509 = vpush %v319_v6 }
 0x27f   : > { %v351_v10 = vadd.f32 %v350_v8, %v349_v2  ;;  %v330_v11 = vadd.f32 %v329_v9, %v328_v4 }
 0x281   : > { %511 = vpush %v330_v11  ;;  %v352_v13 = vrot.slane %v351_v10, 1 }
 0x282   : > { %513 = vpush %v340_v12 }
 0x283   : > { %v353_v14 = vadd.f32 %v352_v13, %v351_v10 }
 0x285   : > { %515 = vpush %v353_v14 }
 0x2ae   : > { %s508_s19 = spop %507 }
 0x2af   : > { %v356_v15 = vstv %s508_s19  ;;  %s510_s21 = spop %509 }
 0x2b0   : > { %v357_v16 = vsel %vm355_vm6, %v356_v15, 0.0  ;;  %v359_v17 = vstv %s510_s21 }
 0x2b1   : > { %v360_v18 = vsel %vm358_vm7, %v359_v17, 0.0 }
 0x2b2   : > { %s512_s23 = spop %511  ;;  %v361_v19 = vadd.f32 %v360_v18, %v357_v16 }
 0x2b3   : > { %v363_v20 = vstv %s512_s23  ;;  %s514_s26 = spop %513 }
 0x2b4   : > { %v364_v21 = vsel %vm362_vm8, %v363_v20, 0.0  ;;  %v367_v22 = vstv %s514_s26 }
 0x2b5   : > { %v365_v23 = vadd.f32 %v364_v21, %v361_v19  ;;  %v368_v24 = vsel %vm366_vm9, %v367_v22, 0.0 }
 0x2b6   : > { %s516_s27 = spop %515 }
 0x2b7   : > { %v369_v25 = vadd.f32 %v368_v24, %v365_v23  ;;  %v371_v26 = vstv %s516_s27 }
 0x2b8   : > { %v372_v27 = vsel %vm370_vm10, %v371_v26, 0.0 }
 0x2b9   : > { %v373_v29 = vadd.f32 %v372_v27, %v369_v25 }
 0x2bb   : > { %v375_v30 = vadd.f32 %v374_v28, %v373_v29 }
 0x2bd   : > { %376 = vst [vmem:[%s774_s18] sm:$0x1] %v375_v30 }
 0x2be   : > { %595 = shalt.err (!%p592_p5)
}
 0x2bf   : > { %s596_s10 = scalar_lea.hbm %s788_s5, 16  ;;  %s600_s19 = scalar_lea.hbm %s841_s3, 32 }
 0x2c0   : > { %p597_p6 = scmp.ne.s32.totalorder %s788_s5, %s596_s10  ;;  %p601_p10 = scmp.lt.u32.totalorder %s788_s5, %s841_s3 }
 0x2c1   : > { %p602_p11 = scmp.lt.u32.totalorder %s600_s19, %s596_s10  ;;  %p604_p13 = scmp.lt.u32.totalorder %s596_s10, %s788_s5 }
 0x2c2   : > { %p598_p7 = pnand %p597_p6, %p725_p4 }
 0x2c3   : > { %p603_p12 = por %p602_p11, %p601_p10 }
 0x2c4   : > { %p599_p9 = pneg %p598_p7 }
 0x2c5   : > { %p605_p0 = por %p604_p13, %p603_p12 }
 0x2c7   : > { %p606_p1 = pnand %p605_p0, %p599_p9 }
 0x2c9   : > { %609 = shalt.err (!%p606_p1)
}
 0x2ca   : > { %517 = dma.vmem_to_hbm [thread:$0]  (%p725_p4), %s790_s29, 16, %s788_s5, %s378_s6  }
 0x2cb PF: > { %p523_p2 = scmp.ge.s32.totalorder %s660_s17, 2  ;;  %s402_s26 = sand.u32 1, %s640_s12  }
 0x2cc   : > { %s403_s27 = scalar_lea.sflag [#allocation3], %s402_s26 }
 0x2cd   : > { %p520_p3 = pnand %p523_p2, %p732_p8 }
 0x2cf   : > { %635 = dma.done.wait (!%p520_p3), %s403_s27, 16  }
 0x2d0   : > { %637 = vsyncadd (!%p520_p3), %s403_s27, 4294967280  ;;  %s16_s17 = sadd.s32 1, %s660_s17   ;;  %s844_s12 = smov %s644_s13 }
 0x2d1   : > { %p13_p5 = scmp.ge.s32.totalorder %s16_s17, 4   ;;  %s845_s13 = smov %s648_s14 }
 0x2d2   : > { %s846_s14 = smov %s738_s25  ;;  %s847_s15 = smov %s656_s16 }
 0x2d3   : > { %s848_s16 = smov %s850_s20  ;;  %15 = sbr.rel (!%p13_p5) target bundleno = 4 (0x4), region = 77 }
 0x2da   :  { %407 = vsyncpa [#allocation3], 1 }
 0x2db   :  { %409 = vsyncpa [#allocation3 + $0x1], 1 }

</bundles_post_ra>
